<compile_context>
chip_gen: v6e
topology: v6e:2x2x1
jax: 0.10.0
libtpu: 0.0.40
codegen_flags: <defaults>
</compile_context>

<pallas_src>
import functools

import jax
import jax.numpy as jnp
from jax.experimental import pallas as pl
from jax.experimental.pallas import tpu as pltpu


def _pick_tile(total, target, mult):
    """Largest divisor of `total` that is a multiple of `mult` and <= target.

    Falls back to the full extent (always a legal block dim) so no shape
    assertion is ever needed.
    """
    best = None
    cand = mult
    lim = min(total, target)
    while cand <= lim:
        if total % cand == 0:
            best = cand
        cand += mult
    return best if best is not None else total


# --------------------------------------------------------------------------
# Kernel 1: fused  (img + text_proj) -> QKV -> flash attention -> w_o + b_o.
# Channel-major everywhere: channels/heads on sublanes, spatial on lanes.
#
#   xq_ref : (1, C, tq)   x tile for the query positions   (index (b, 0, qi))
#   xk_ref : (1, C, tk)   x tile for the key/value positions (index (b, 0, ki))
#   t_ref  : (1, C, 1)    per-(b, c) text projection (broadcast add)
#   wq_ref : (inner, C)   Q weights, softmax scale pre-folded
#   wkv_ref: (2*inner, C) concatenated K/V weights
#   wo_ref : (C, inner)   output projection
#   bo_ref : (C, 1)       output projection bias
#   o_ref  : (1, C, tq)   attended tile (post w_o), lane-dense
#
# Scratch (f32, persistent across the ki reduction axis):
#   q_sc   : (inner, tq)  scaled Q, computed once at ki == 0
#   m_sc   : (heads, tq)  running max per head
#   l_sc   : (heads, tq)  running denominator per head
#   acc_sc : (inner, tq)  output accumulator (all heads stacked)
# --------------------------------------------------------------------------
def _fused_attn_kernel(xq_ref, xk_ref, t_ref, wq_ref, wkv_ref, wo_ref, bo_ref,
                       o_ref, q_sc, m_sc, l_sc, acc_sc, *, heads, dim_head):
    ki = pl.program_id(2)
    inner = heads * dim_head

    @pl.when(ki == 0)
    def _init():
        xq = xq_ref[0] + t_ref[0]                                  # (C, tq)
        q_sc[...] = jnp.dot(wq_ref[...], xq,
                            preferred_element_type=jnp.float32)    # scaled Q
        m_sc[...] = jnp.full(m_sc.shape, -jnp.inf, m_sc.dtype)
        l_sc[...] = jnp.zeros(l_sc.shape, l_sc.dtype)
        acc_sc[...] = jnp.zeros(acc_sc.shape, acc_sc.dtype)

    # K/V for this k-tile (recomputed per tile: 2*C*2*inner*tk flops, tiny).
    xk = xk_ref[0] + t_ref[0]                                      # (C, tk)
    kv = jnp.dot(wkv_ref[...], xk,
                 preferred_element_type=jnp.float32)               # (2*inner, tk)

    for h in range(heads):                                         # unrolled
        lo, hi = h * dim_head, (h + 1) * dim_head
        q_h = q_sc[lo:hi, :]                                       # (dh, tq)
        k_h = kv[lo:hi, :]                                         # (dh, tk)
        v_h = kv[inner + lo:inner + hi, :]                         # (dh, tk)

        # logits[k, q] = sum_d k[d, k] * q[d, q]  (softmax axis = rows)
        s = jax.lax.dot_general(k_h, q_h, (((0,), (0,)), ((), ())),
                                preferred_element_type=jnp.float32)  # (tk, tq)

        m_prev = m_sc[h:h + 1, :]                                  # (1, tq)
        m_new = jnp.maximum(m_prev, jnp.max(s, axis=0, keepdims=True))
        alpha = jnp.exp(m_prev - m_new)                            # (1, tq)
        p = jnp.exp(s - m_new)                                     # (tk, tq)
        l_sc[h:h + 1, :] = (alpha * l_sc[h:h + 1, :]
                            + jnp.sum(p, axis=0, keepdims=True))
        pv = jnp.dot(v_h, p, preferred_element_type=jnp.float32)   # (dh, tq)
        acc_sc[lo:hi, :] = alpha * acc_sc[lo:hi, :] + pv
        m_sc[h:h + 1, :] = m_new

    @pl.when(ki == pl.num_programs(2) - 1)
    def _finalize():
        for h in range(heads):
            lo, hi = h * dim_head, (h + 1) * dim_head
            inv = pl.reciprocal(l_sc[h:h + 1, :], approx=True)     # EUP
            acc_sc[lo:hi, :] = acc_sc[lo:hi, :] * inv
        att = jnp.dot(wo_ref[...].astype(jnp.float32), acc_sc[...],
                      preferred_element_type=jnp.float32)          # (C, tq)
        att = att + bo_ref[...].astype(jnp.float32)
        o_ref[0] = att.astype(o_ref.dtype)


# --------------------------------------------------------------------------
# Kernel 2: to_out = LayerNorm(dim) + Linear(dim, dim) over the trailing W
# axis, plus the residual add of img_features -- computed in the permuted
# (BC, W, DH) layout so W (the LN axis) is on sublanes and DH on lanes.
#
#   a_ref/r_ref : (1, W, tn)   attended tile / residual (permuted img) tile
#   g_ref/b_ref : (W, 1)       LN affine
#   w2_ref      : (W, W)       Linear weight (y = w2 @ x in column layout)
#   b2_ref      : (W, 1)       Linear bias
# --------------------------------------------------------------------------
def _ln_linear_residual_kernel(a_ref, r_ref, g_ref, b_ref, w2_ref, b2_ref,
                               o_ref, *, eps):
    x = a_ref[0].astype(jnp.float32)                               # (W, tn)
    mu = jnp.mean(x, axis=0, keepdims=True)                        # (1, tn)
    xc = x - mu
    var = jnp.mean(xc * xc, axis=0, keepdims=True)                 # biased, torch
    xn = xc * jax.lax.rsqrt(var + eps)
    xn = xn * g_ref[...].astype(jnp.float32) + b_ref[...].astype(jnp.float32)
    y = jnp.dot(w2_ref[...].astype(jnp.float32), xn,
                preferred_element_type=jnp.float32)                # (W, tn)
    y = y + b2_ref[...].astype(jnp.float32)
    o_ref[0] = (y + r_ref[0].astype(jnp.float32)).astype(o_ref.dtype)


# --------------------------------------------------------------------------
# Wrapper
# --------------------------------------------------------------------------
def cross_attention_forward(img_features, text_features, params, *,
                            heads, dim_head):
    B, C, D, H, W = img_features.shape
    dim = params["ln_g"].shape[0]
    if C != dim:
        raise ValueError(f"img_features channels ({C}) must match dim ({dim})")
    if W != dim:
        # Mirror of the reference: to_out acts over the trailing spatial axis.
        raise ValueError(f"to_out requires trailing width ({W}) == dim ({dim})")

    DH = D * H
    S = DH * W
    inner = heads * dim_head
    scale = float(dim_head) ** -0.5
    dtype = img_features.dtype
    esize = jnp.dtype(dtype).itemsize

    # Fold the softmax scale into w_q once (tiny (inner, C) op, f32).
    w_q = (params["w_q"].astype(jnp.float32) * scale).astype(dtype)
    w_kv = params["w_kv"].astype(dtype)
    w_o = params["w_o"].astype(dtype)
    b_o = params["b_o"].astype(jnp.float32).reshape(C, 1)

    # Tiny (B, text_dim) -> (B, dim) projection stays in XLA; the broadcast
    # add over all spatial positions is fused into the attention kernel.
    tproj = jnp.dot(text_features, params["w_tp"].T) + params["b_tp"]
    tproj3 = tproj.astype(dtype).reshape(B, C, 1)

    # Channel-major, spatially PERMUTED layout: (B, C, W, DH).  The trailing
    # LayerNorm axis (W) lands on sublanes in kernel 2 while the big DH axis
    # stays on lanes.  Self-attention is permutation-invariant over the
    # spatial axis, so kernel 1 runs directly in this order.
    img_p = jnp.transpose(img_features.reshape(B, C, DH, W), (0, 1, 3, 2))
    x3 = img_p.reshape(B, C, S)            # spatial flattened, dh fastest

    tq = _pick_tile(S, 1024, 128)
    tk = _pick_tile(S, 512, 128)
    nq, nk = S // tq, S // tk

    # ---- Kernel 1: fused QKV + flash attention + output projection ---------
    attn_cost = pl.CostEstimate(
        flops=int(4 * B * inner * S * S                      # logits + PV
                  + 2 * B * C * inner * S * (2 * nq + 2)),   # Q once, KV per qi, w_o
        transcendentals=int(B * heads * S * S),
        bytes_accessed=int(esize * (nq + 2) * B * C * S      # x (q), x (kv re-read), out
                           + 4 * (3 * inner * C + C * inner + 2 * C)),
    )

    attended = pl.pallas_call(
        functools.partial(_fused_attn_kernel, heads=heads, dim_head=dim_head),
        out_shape=jax.ShapeDtypeStruct((B, C, S), dtype),
        grid_spec=pltpu.PrefetchScalarGridSpec(
            num_scalar_prefetch=0,
            grid=(B, nq, nk),
            in_specs=[
                pl.BlockSpec((1, C, tq), lambda b, qi, ki: (b, 0, qi)),   # x for Q
                pl.BlockSpec((1, C, tk), lambda b, qi, ki: (b, 0, ki)),   # x for K/V
                pl.BlockSpec((1, C, 1), lambda b, qi, ki: (b, 0, 0)),     # text proj
                pl.BlockSpec((inner, C), lambda b, qi, ki: (0, 0)),       # w_q (scaled)
                pl.BlockSpec((2 * inner, C), lambda b, qi, ki: (0, 0)),   # w_kv
                pl.BlockSpec((C, inner), lambda b, qi, ki: (0, 0)),       # w_o
                pl.BlockSpec((C, 1), lambda b, qi, ki: (0, 0)),           # b_o
            ],
            out_specs=pl.BlockSpec((1, C, tq), lambda b, qi, ki: (b, 0, qi)),
            scratch_shapes=[
                pltpu.VMEM((inner, tq), jnp.float32),    # scaled Q
                pltpu.VMEM((heads, tq), jnp.float32),    # running max
                pltpu.VMEM((heads, tq), jnp.float32),    # running denom
                pltpu.VMEM((inner, tq), jnp.float32),    # output accumulator
            ],
        ),
        compiler_params=pltpu.CompilerParams(
            dimension_semantics=("parallel", "parallel", "arbitrary"),
            vmem_limit_bytes=48 * 1024 * 1024),
        cost_estimate=attn_cost,
    )(x3, x3, tproj3, w_q, w_kv, w_o, b_o)

    # ---- Kernel 2: LayerNorm + Linear over W + residual (lane-dense) -------
    BC = B * C
    a3 = attended.reshape(BC, W, DH)       # free reshape (DH is fastest axis)
    r3 = img_p.reshape(BC, W, DH)          # residual in the same permuted view
    tn = _pick_tile(DH, 2048, 128)
    n_n = DH // tn

    g2 = params["ln_g"].astype(jnp.float32).reshape(W, 1)
    be2 = params["ln_b"].astype(jnp.float32).reshape(W, 1)
    w22 = params["w_2"].astype(jnp.float32)              # (W, W): y = w_2 @ x
    b22 = params["b_2"].astype(jnp.float32).reshape(W, 1)

    ln_cost = pl.CostEstimate(
        flops=int(2 * BC * DH * W * W + 10 * BC * DH * W),
        transcendentals=int(BC * DH),
        bytes_accessed=int(esize * 3 * BC * W * DH + 4 * (W * W + 4 * W)),
    )

    y3 = pl.pallas_call(
        functools.partial(_ln_linear_residual_kernel, eps=1e-5),
        out_shape=jax.ShapeDtypeStruct((BC, W, DH), dtype),
        grid_spec=pltpu.PrefetchScalarGridSpec(
            num_scalar_prefetch=0,
            grid=(BC, n_n),
            in_specs=[
                pl.BlockSpec((1, W, tn), lambda i, j: (i, 0, j)),
                pl.BlockSpec((1, W, tn), lambda i, j: (i, 0, j)),
                pl.BlockSpec((W, 1), lambda i, j: (0, 0)),
                pl.BlockSpec((W, 1), lambda i, j: (0, 0)),
                pl.BlockSpec((W, W), lambda i, j: (0, 0)),
                pl.BlockSpec((W, 1), lambda i, j: (0, 0)),
            ],
            out_specs=pl.BlockSpec((1, W, tn), lambda i, j: (i, 0, j)),
        ),
        compiler_params=pltpu.CompilerParams(
            dimension_semantics=("parallel", "parallel")),
        cost_estimate=ln_cost,
    )(a3, r3, g2, be2, w22, b22)

    # Undo the spatial permutation: (B, C, W, DH) -> (B, C, D, H, W).
    out = jnp.transpose(y3.reshape(B, C, W, DH), (0, 1, 3, 2))
    return out.reshape(B, C, D, H, W)


# --------------------------------------------------------------------------
# Pure-JAX reference (mirrors the PyTorch forward exactly).
# --------------------------------------------------------------------------
def _reference(img, text, params, *, heads, dim_head):
    B, C, D, H, W = img.shape
    S = D * H * W
    inner = heads * dim_head
    scale = float(dim_head) ** -0.5
    hp = jax.lax.Precision.HIGHEST

    tproj = jnp.dot(text, params["w_tp"].T, precision=hp) + params["b_tp"]
    fused = img + tproj[:, :, None, None, None]
    x = fused.reshape(B, C, S).transpose(0, 2, 1)                  # (B, S, C)

    q = jnp.dot(x, params["w_q"].T, precision=hp)
    kv = jnp.dot(x, params["w_kv"].T, precision=hp)
    k, v = kv[..., :inner], kv[..., inner:]

    def split(t):
        return t.reshape(B, S, heads, dim_head).transpose(0, 2, 1, 3)

    q = split(q) * scale
    k = split(k)
    v = split(v)

    logits = jnp.einsum("bhqd,bhkd->bhqk", q, k, precision=hp)
    attn = jax.nn.softmax(logits, axis=-1)
    out = jnp.einsum("bhqk,bhkd->bhqd", attn, v, precision=hp)
    out = out.transpose(0, 2, 1, 3).reshape(B, S, inner)
    out = jnp.dot(out, params["w_o"].T, precision=hp) + params["b_o"]

    attended = out.transpose(0, 2, 1).reshape(B, C, D, H, W)
    mu = attended.mean(-1, keepdims=True)
    var = ((attended - mu) ** 2).mean(-1, keepdims=True)
    ln = (attended - mu) / jnp.sqrt(var + 1e-5) * params["ln_g"] + params["ln_b"]
    y = jnp.dot(ln, params["w_2"].T, precision=hp) + params["b_2"]
    return y + img


if __name__ == "__main__":
    key = jax.random.PRNGKey(0)
    ks = jax.random.split(key, 12)

    # Small shapes consistent with the module; trailing width must equal dim.
    B, dim, depth, height, width = 2, 8, 2, 4, 8
    heads, dim_head, text_dim = 2, 16, 32
    inner = heads * dim_head

    img = jax.random.normal(ks[0], (B, dim, depth, height, width), jnp.float32)
    text = jax.random.normal(ks[1], (B, text_dim), jnp.float32)

    params = {
        "w_tp": jax.random.normal(ks[2], (dim, text_dim), jnp.float32) * 0.05,
        "b_tp": jax.random.normal(ks[3], (dim,), jnp.float32) * 0.05,
        "w_q": jax.random.normal(ks[4], (inner, dim), jnp.float32) * 0.3,
        "w_kv": jax.random.normal(ks[5], (2 * inner, dim), jnp.float32) * 0.3,
        "w_o": jax.random.normal(ks[6], (dim, inner), jnp.float32) * 0.2,
        "b_o": jax.random.normal(ks[7], (dim,), jnp.float32) * 0.1,
        "ln_g": 1.0 + 0.1 * jax.random.normal(ks[8], (dim,), jnp.float32),
        "ln_b": 0.1 * jax.random.normal(ks[9], (dim,), jnp.float32),
        "w_2": jax.random.normal(ks[10], (dim, dim), jnp.float32) * 0.2,
        "b_2": jax.random.normal(ks[11], (dim,), jnp.float32) * 0.1,
    }

    fwd = jax.jit(functools.partial(cross_attention_forward,
                                    heads=heads, dim_head=dim_head))
    out = jax.block_until_ready(fwd(img, text, params))

    ref = jax.block_until_ready(
        _reference(img, text, params, heads=heads, dim_head=dim_head))

    assert out.shape == img.shape and out.dtype == img.dtype
    max_err = float(jnp.max(jnp.abs(out - ref)))
    assert max_err < 2e-2, f"max abs error vs reference: {max_err}"

    print("KERNEL_OK")
</pallas_src>

<mosaic_0001>
module attributes {stable_mosaic.version = 11 : i64} {
  func.func @_ln_linear_residual_kernel(%arg0: i32, %arg1: i32, %arg2: memref<1x8x8xf32, #tpu.memory_space<vmem>>, %arg3: memref<1x8x8xf32, #tpu.memory_space<vmem>>, %arg4: memref<8x1xf32, #tpu.memory_space<vmem>>, %arg5: memref<8x1xf32, #tpu.memory_space<vmem>>, %arg6: memref<8x8xf32, #tpu.memory_space<vmem>>, %arg7: memref<8x1xf32, #tpu.memory_space<vmem>>, %arg8: memref<1x8x8xf32, #tpu.memory_space<vmem>>) attributes {dimension_semantics = [#tpu.dimension_semantics<parallel>, #tpu.dimension_semantics<parallel>], iteration_bounds = array<i64: 16, 1>, scalar_prefetch = 0 : i64, scratch_operands = 0 : i64, tpu.core_type = #tpu.core_type<tc>, window_params = [{transform_indices = @transform_0, window_bounds = array<i64: 1, 8, 8>}, {transform_indices = @transform_1, window_bounds = array<i64: 1, 8, 8>}, {pipeline_mode = #tpu.pipeline_mode<synchronous>, transform_indices = @transform_2, window_bounds = array<i64: 8, 1>}, {pipeline_mode = #tpu.pipeline_mode<synchronous>, transform_indices = @transform_3, window_bounds = array<i64: 8, 1>}, {pipeline_mode = #tpu.pipeline_mode<synchronous>, transform_indices = @transform_4, window_bounds = array<i64: 8, 8>}, {pipeline_mode = #tpu.pipeline_mode<synchronous>, transform_indices = @transform_5, window_bounds = array<i64: 8, 1>}, {transform_indices = @transform_6, window_bounds = array<i64: 1, 8, 8>}]} {
    %c0 = arith.constant 0 : index
    %c0_0 = arith.constant 0 : index
    %c0_1 = arith.constant 0 : index
    %0 = vector.load %arg2[%c0, %c0_0, %c0_1] : memref<1x8x8xf32, #tpu.memory_space<vmem>>, vector<1x8x8xf32>
    %1 = vector.shape_cast %0 : vector<1x8x8xf32> to vector<8x8xf32>
    %cst = arith.constant dense<0.000000e+00> : vector<8xf32>
    %2 = vector.multi_reduction <add>, %1, %cst [0] : vector<8x8xf32> to vector<8xf32>
    %3 = vector.shape_cast %2 : vector<8xf32> to vector<1x8xf32>
    %cst_2 = arith.constant 8.000000e+00 : f32
    %4 = vector.broadcast %cst_2 : f32 to vector<1x8xf32>
    %5 = arith.divf %3, %4 : vector<1x8xf32>
    %6 = vector.broadcast %5 : vector<1x8xf32> to vector<8x8xf32>
    %7 = arith.subf %1, %6 : vector<8x8xf32>
    %8 = arith.mulf %7, %7 : vector<8x8xf32>
    %cst_3 = arith.constant dense<0.000000e+00> : vector<8xf32>
    %9 = vector.multi_reduction <add>, %8, %cst_3 [0] : vector<8x8xf32> to vector<8xf32>
    %10 = vector.shape_cast %9 : vector<8xf32> to vector<1x8xf32>
    %cst_4 = arith.constant 8.000000e+00 : f32
    %11 = vector.broadcast %cst_4 : f32 to vector<1x8xf32>
    %12 = arith.divf %10, %11 : vector<1x8xf32>
    %cst_5 = arith.constant 9.99999974E-6 : f32
    %13 = vector.broadcast %cst_5 : f32 to vector<1x8xf32>
    %14 = arith.addf %12, %13 : vector<1x8xf32>
    %15 = math.rsqrt %14 : vector<1x8xf32>
    %16 = vector.broadcast %15 : vector<1x8xf32> to vector<8x8xf32>
    %17 = arith.mulf %7, %16 : vector<8x8xf32>
    %c0_6 = arith.constant 0 : index
    %c0_7 = arith.constant 0 : index
    %18 = vector.load %arg4[%c0_6, %c0_7] : memref<8x1xf32, #tpu.memory_space<vmem>>, vector<8x1xf32>
    %19 = vector.broadcast %18 : vector<8x1xf32> to vector<8x8xf32>
    %20 = arith.mulf %17, %19 : vector<8x8xf32>
    %c0_8 = arith.constant 0 : index
    %c0_9 = arith.constant 0 : index
    %21 = vector.load %arg5[%c0_8, %c0_9] : memref<8x1xf32, #tpu.memory_space<vmem>>, vector<8x1xf32>
    %22 = vector.broadcast %21 : vector<8x1xf32> to vector<8x8xf32>
    %23 = arith.addf %20, %22 : vector<8x8xf32>
    %c0_10 = arith.constant 0 : index
    %c0_11 = arith.constant 0 : index
    %24 = vector.load %arg6[%c0_10, %c0_11] : memref<8x8xf32, #tpu.memory_space<vmem>>, vector<8x8xf32>
    %cst_12 = arith.constant dense<0.000000e+00> : vector<8x8xf32>
    %25 = tpu.matmul %24, %23, %cst_12 {dimension_numbers = #tpu.dot_dimension_numbers<[1], [0], [0], [1], [0, 0, 1, 1], [], []>} : vector<8x8xf32>, vector<8x8xf32>, vector<8x8xf32> -> vector<8x8xf32>
    %c0_13 = arith.constant 0 : index
    %c0_14 = arith.constant 0 : index
    %26 = vector.load %arg7[%c0_13, %c0_14] : memref<8x1xf32, #tpu.memory_space<vmem>>, vector<8x1xf32>
    %27 = vector.broadcast %26 : vector<8x1xf32> to vector<8x8xf32>
    %28 = arith.addf %25, %27 : vector<8x8xf32>
    %c0_15 = arith.constant 0 : index
    %c0_16 = arith.constant 0 : index
    %c0_17 = arith.constant 0 : index
    %29 = vector.load %arg3[%c0_15, %c0_16, %c0_17] : memref<1x8x8xf32, #tpu.memory_space<vmem>>, vector<1x8x8xf32>
    %30 = vector.shape_cast %29 : vector<1x8x8xf32> to vector<8x8xf32>
    %31 = arith.addf %28, %30 : vector<8x8xf32>
    %c0_18 = arith.constant 0 : index
    %c0_19 = arith.constant 0 : index
    %c0_20 = arith.constant 0 : index
    %32 = vector.load %arg8[%c0_18, %c0_19, %c0_20] : memref<1x8x8xf32, #tpu.memory_space<vmem>>, vector<1x8x8xf32>
    %33 = vector.shape_cast %32 : vector<1x8x8xf32> to vector<8x8xf32>
    %34 = vector.shape_cast %31 : vector<8x8xf32> to vector<1x8x8xf32>
    tpu.vector_store %arg8[%c0_18, %c0_19, %c0_20], %34 {strides = array<i32>} : memref<1x8x8xf32, #tpu.memory_space<vmem>>, vector<1x8x8xf32>,
    return
  }
  func.func @transform_0(%arg0: i32, %arg1: i32) -> (i32, i32, i32) {
    %c0_i32 = arith.constant 0 : i32
    %c0_i32_0 = arith.constant 0 : i32
    return %arg0, %c0_i32, %arg1 : i32, i32, i32
  }
  func.func @transform_1(%arg0: i32, %arg1: i32) -> (i32, i32, i32) {
    %c0_i32 = arith.constant 0 : i32
    %c0_i32_0 = arith.constant 0 : i32
    return %arg0, %c0_i32, %arg1 : i32, i32, i32
  }
  func.func @transform_2(%arg0: i32, %arg1: i32) -> (i32, i32) {
    %c0_i32 = arith.constant 0 : i32
    %c0_i32_0 = arith.constant 0 : i32
    %c0_i32_1 = arith.constant 0 : i32
    return %c0_i32, %c0_i32_0 : i32, i32
  }
  func.func @transform_3(%arg0: i32, %arg1: i32) -> (i32, i32) {
    %c0_i32 = arith.constant 0 : i32
    %c0_i32_0 = arith.constant 0 : i32
    %c0_i32_1 = arith.constant 0 : i32
    return %c0_i32, %c0_i32_0 : i32, i32
  }
  func.func @transform_4(%arg0: i32, %arg1: i32) -> (i32, i32) {
    %c0_i32 = arith.constant 0 : i32
    %c0_i32_0 = arith.constant 0 : i32
    %c0_i32_1 = arith.constant 0 : i32
    return %c0_i32, %c0_i32_0 : i32, i32
  }
  func.func @transform_5(%arg0: i32, %arg1: i32) -> (i32, i32) {
    %c0_i32 = arith.constant 0 : i32
    %c0_i32_0 = arith.constant 0 : i32
    %c0_i32_1 = arith.constant 0 : i32
    return %c0_i32, %c0_i32_0 : i32, i32
  }
  func.func @transform_6(%arg0: i32, %arg1: i32) -> (i32, i32, i32) {
    %c0_i32 = arith.constant 0 : i32
    %c0_i32_0 = arith.constant 0 : i32
    return %arg0, %c0_i32, %arg1 : i32, i32, i32
  }
}

module attributes {stable_mosaic.version = 11 : i64} {
  func.func @_fused_attn_kernel(%arg0: i32, %arg1: i32, %arg2: i32, %arg3: memref<1x8x64xf32, #tpu.memory_space<vmem>>, %arg4: memref<1x8x64xf32, #tpu.memory_space<vmem>>, %arg5: memref<1x8x1xf32, #tpu.memory_space<vmem>>, %arg6: memref<32x8xf32, #tpu.memory_space<vmem>>, %arg7: memref<64x8xf32, #tpu.memory_space<vmem>>, %arg8: memref<8x32xf32, #tpu.memory_space<vmem>>, %arg9: memref<8x1xf32, #tpu.memory_space<vmem>>, %arg10: memref<1x8x64xf32, #tpu.memory_space<vmem>>, %arg11: memref<32x64xf32, #tpu.memory_space<vmem>>, %arg12: memref<2x64xf32, #tpu.memory_space<vmem>>, %arg13: memref<2x64xf32, #tpu.memory_space<vmem>>, %arg14: memref<32x64xf32, #tpu.memory_space<vmem>>) attributes {dimension_semantics = [#tpu.dimension_semantics<parallel>, #tpu.dimension_semantics<parallel>, #tpu.dimension_semantics<arbitrary>], iteration_bounds = array<i64: 2, 1, 1>, scalar_prefetch = 0 : i64, scratch_operands = 4 : i64, tpu.core_type = #tpu.core_type<tc>, window_params = [{transform_indices = @transform_0, window_bounds = array<i64: 1, 8, 64>}, {transform_indices = @transform_1, window_bounds = array<i64: 1, 8, 64>}, {transform_indices = @transform_2, window_bounds = array<i64: 1, 8, 1>}, {pipeline_mode = #tpu.pipeline_mode<synchronous>, transform_indices = @transform_3, window_bounds = array<i64: 32, 8>}, {pipeline_mode = #tpu.pipeline_mode<synchronous>, transform_indices = @transform_4, window_bounds = array<i64: 64, 8>}, {pipeline_mode = #tpu.pipeline_mode<synchronous>, transform_indices = @transform_5, window_bounds = array<i64: 8, 32>}, {pipeline_mode = #tpu.pipeline_mode<synchronous>, transform_indices = @transform_6, window_bounds = array<i64: 8, 1>}, {transform_indices = @transform_7, window_bounds = array<i64: 1, 8, 64>}]} {
    %c0_i32 = arith.constant 0 : i32
    %0 = arith.cmpi eq, %arg2, %c0_i32 : i32
    %1 = arith.extui %0 : i1 to i32
    %c0_i32_0 = arith.constant 0 : i32
    %2 = arith.cmpi ne, %1, %c0_i32_0 : i32
    scf.if %2 {
      %c0_44 = arith.constant 0 : index
      %c0_45 = arith.constant 0 : index
      %c0_46 = arith.constant 0 : index
      %66 = vector.load %arg3[%c0_44, %c0_45, %c0_46] : memref<1x8x64xf32, #tpu.memory_space<vmem>>, vector<1x8x64xf32>
      %67 = vector.shape_cast %66 : vector<1x8x64xf32> to vector<8x64xf32>
      %c0_47 = arith.constant 0 : index
      %c0_48 = arith.constant 0 : index
      %c0_49 = arith.constant 0 : index
      %68 = vector.load %arg5[%c0_47, %c0_48, %c0_49] : memref<1x8x1xf32, #tpu.memory_space<vmem>>, vector<1x8x1xf32>
      %69 = vector.shape_cast %68 : vector<1x8x1xf32> to vector<8x1xf32>
      %70 = vector.broadcast %69 : vector<8x1xf32> to vector<8x64xf32>
      %71 = arith.addf %67, %70 : vector<8x64xf32>
      %c0_50 = arith.constant 0 : index
      %c0_51 = arith.constant 0 : index
      %72 = vector.load %arg6[%c0_50, %c0_51] : memref<32x8xf32, #tpu.memory_space<vmem>>, vector<32x8xf32>
      %cst_52 = arith.constant dense<0.000000e+00> : vector<32x64xf32>
      %73 = tpu.matmul %72, %71, %cst_52 {dimension_numbers = #tpu.dot_dimension_numbers<[1], [0], [0], [1], [0, 0, 1, 1], [], []>} : vector<32x8xf32>, vector<8x64xf32>, vector<32x64xf32> -> vector<32x64xf32>
      %c0_53 = arith.constant 0 : index
      %c0_54 = arith.constant 0 : index
      %74 = vector.load %arg11[%c0_53, %c0_54] : memref<32x64xf32, #tpu.memory_space<vmem>>, vector<32x64xf32>
      tpu.vector_store %arg11[%c0_53, %c0_54], %73 {strides = array<i32>} : memref<32x64xf32, #tpu.memory_space<vmem>>, vector<32x64xf32>,
      %cst_55 = arith.constant 0xFF800000 : f32
      %75 = vector.broadcast %cst_55 : f32 to vector<2x64xf32>
      %c0_56 = arith.constant 0 : index
      %c0_57 = arith.constant 0 : index
      %76 = vector.load %arg12[%c0_56, %c0_57] : memref<2x64xf32, #tpu.memory_space<vmem>>, vector<2x64xf32>
      tpu.vector_store %arg12[%c0_56, %c0_57], %75 {strides = array<i32>} : memref<2x64xf32, #tpu.memory_space<vmem>>, vector<2x64xf32>,
      %cst_58 = arith.constant 0.000000e+00 : f32
      %77 = vector.broadcast %cst_58 : f32 to vector<2x64xf32>
      %c0_59 = arith.constant 0 : index
      %c0_60 = arith.constant 0 : index
      %78 = vector.load %arg13[%c0_59, %c0_60] : memref<2x64xf32, #tpu.memory_space<vmem>>, vector<2x64xf32>
      tpu.vector_store %arg13[%c0_59, %c0_60], %77 {strides = array<i32>} : memref<2x64xf32, #tpu.memory_space<vmem>>, vector<2x64xf32>,
      %cst_61 = arith.constant 0.000000e+00 : f32
      %79 = vector.broadcast %cst_61 : f32 to vector<32x64xf32>
      %c0_62 = arith.constant 0 : index
      %c0_63 = arith.constant 0 : index
      %80 = vector.load %arg14[%c0_62, %c0_63] : memref<32x64xf32, #tpu.memory_space<vmem>>, vector<32x64xf32>
      tpu.vector_store %arg14[%c0_62, %c0_63], %79 {strides = array<i32>} : memref<32x64xf32, #tpu.memory_space<vmem>>, vector<32x64xf32>,
    } else {
    }
    %c0 = arith.constant 0 : index
    %c0_1 = arith.constant 0 : index
    %c0_2 = arith.constant 0 : index
    %3 = vector.load %arg4[%c0, %c0_1, %c0_2] : memref<1x8x64xf32, #tpu.memory_space<vmem>>, vector<1x8x64xf32>
    %4 = vector.shape_cast %3 : vector<1x8x64xf32> to vector<8x64xf32>
    %c0_3 = arith.constant 0 : index
    %c0_4 = arith.constant 0 : index
    %c0_5 = arith.constant 0 : index
    %5 = vector.load %arg5[%c0_3, %c0_4, %c0_5] : memref<1x8x1xf32, #tpu.memory_space<vmem>>, vector<1x8x1xf32>
    %6 = vector.shape_cast %5 : vector<1x8x1xf32> to vector<8x1xf32>
    %7 = vector.broadcast %6 : vector<8x1xf32> to vector<8x64xf32>
    %8 = arith.addf %4, %7 : vector<8x64xf32>
    %c0_6 = arith.constant 0 : index
    %c0_7 = arith.constant 0 : index
    %9 = vector.load %arg7[%c0_6, %c0_7] : memref<64x8xf32, #tpu.memory_space<vmem>>, vector<64x8xf32>
    %cst = arith.constant dense<0.000000e+00> : vector<64x64xf32>
    %10 = tpu.matmul %9, %8, %cst {dimension_numbers = #tpu.dot_dimension_numbers<[1], [0], [0], [1], [0, 0, 1, 1], [], []>} : vector<64x8xf32>, vector<8x64xf32>, vector<64x64xf32> -> vector<64x64xf32>
    %c0_8 = arith.constant 0 : index
    %c0_9 = arith.constant 0 : index
    %11 = vector.load %arg11[%c0_8, %c0_9] : memref<32x64xf32, #tpu.memory_space<vmem>>, vector<16x64xf32>
    %12 = vector.extract_strided_slice %10 {offsets = [0, 0], sizes = [16, 64], strides = [1, 1]} : vector<64x64xf32> to vector<16x64xf32>
    %13 = vector.extract_strided_slice %10 {offsets = [32, 0], sizes = [16, 64], strides = [1, 1]} : vector<64x64xf32> to vector<16x64xf32>
    %cst_10 = arith.constant dense<0.000000e+00> : vector<64x64xf32>
    %14 = tpu.matmul %12, %11, %cst_10 {dimension_numbers = #tpu.dot_dimension_numbers<[0], [0], [1], [1], [0, 1, 1, 1], [], []>} : vector<16x64xf32>, vector<16x64xf32>, vector<64x64xf32> -> vector<64x64xf32>
    %c0_11 = arith.constant 0 : index
    %c0_12 = arith.constant 0 : index
    %15 = vector.load %arg12[%c0_11, %c0_12] : memref<2x64xf32, #tpu.memory_space<vmem>>, vector<1x64xf32>
    %cst_13 = arith.constant dense<0xFF800000> : vector<64xf32>
    %16 = vector.multi_reduction <maximumf>, %14, %cst_13 [0] : vector<64x64xf32> to vector<64xf32>
    %17 = vector.shape_cast %16 : vector<64xf32> to vector<1x64xf32>
    %18 = arith.maximumf %15, %17 : vector<1x64xf32>
    %19 = arith.subf %15, %18 : vector<1x64xf32>
    %20 = math.exp %19 : vector<1x64xf32>
    %21 = vector.broadcast %18 : vector<1x64xf32> to vector<64x64xf32>
    %22 = arith.subf %14, %21 : vector<64x64xf32>
    %23 = math.exp %22 : vector<64x64xf32>
    %c0_14 = arith.constant 0 : index
    %c0_15 = arith.constant 0 : index
    %24 = vector.load %arg13[%c0_14, %c0_15] : memref<2x64xf32, #tpu.memory_space<vmem>>, vector<1x64xf32>
    %25 = arith.mulf %20, %24 : vector<1x64xf32>
    %cst_16 = arith.constant dense<0.000000e+00> : vector<64xf32>
    %26 = vector.multi_reduction <add>, %23, %cst_16 [0] : vector<64x64xf32> to vector<64xf32>
    %27 = vector.shape_cast %26 : vector<64xf32> to vector<1x64xf32>
    %28 = arith.addf %25, %27 : vector<1x64xf32>
    %c0_17 = arith.constant 0 : index
    %c0_18 = arith.constant 0 : index
    %29 = vector.load %arg13[%c0_17, %c0_18] : memref<2x64xf32, #tpu.memory_space<vmem>>, vector<1x64xf32>
    tpu.vector_store %arg13[%c0_17, %c0_18], %28 {strides = array<i32>} : memref<2x64xf32, #tpu.memory_space<vmem>>, vector<1x64xf32>,
    %cst_19 = arith.constant dense<0.000000e+00> : vector<16x64xf32>
    %30 = tpu.matmul %13, %23, %cst_19 {dimension_numbers = #tpu.dot_dimension_numbers<[1], [0], [0], [1], [0, 0, 1, 1], [], []>} : vector<16x64xf32>, vector<64x64xf32>, vector<16x64xf32> -> vector<16x64xf32>
    %c0_20 = arith.constant 0 : index
    %c0_21 = arith.constant 0 : index
    %31 = vector.load %arg14[%c0_20, %c0_21] : memref<32x64xf32, #tpu.memory_space<vmem>>, vector<16x64xf32>
    %32 = vector.broadcast %20 : vector<1x64xf32> to vector<16x64xf32>
    %33 = arith.mulf %32, %31 : vector<16x64xf32>
    %34 = arith.addf %33, %30 : vector<16x64xf32>
    %c0_22 = arith.constant 0 : index
    %c0_23 = arith.constant 0 : index
    %35 = vector.load %arg14[%c0_22, %c0_23] : memref<32x64xf32, #tpu.memory_space<vmem>>, vector<16x64xf32>
    tpu.vector_store %arg14[%c0_22, %c0_23], %34 {strides = array<i32>} : memref<32x64xf32, #tpu.memory_space<vmem>>, vector<16x64xf32>,
    %c0_24 = arith.constant 0 : index
    %c0_25 = arith.constant 0 : index
    %36 = vector.load %arg12[%c0_24, %c0_25] : memref<2x64xf32, #tpu.memory_space<vmem>>, vector<1x64xf32>
    tpu.vector_store %arg12[%c0_24, %c0_25], %18 {strides = array<i32>} : memref<2x64xf32, #tpu.memory_space<vmem>>, vector<1x64xf32>,
    %c16 = arith.constant 16 : index
    %c0_26 = arith.constant 0 : index
    %37 = vector.load %arg11[%c16, %c0_26] : memref<32x64xf32, #tpu.memory_space<vmem>>, vector<16x64xf32>
    %38 = vector.extract_strided_slice %10 {offsets = [16, 0], sizes = [16, 64], strides = [1, 1]} : vector<64x64xf32> to vector<16x64xf32>
    %39 = vector.extract_strided_slice %10 {offsets = [48, 0], sizes = [16, 64], strides = [1, 1]} : vector<64x64xf32> to vector<16x64xf32>
    %cst_27 = arith.constant dense<0.000000e+00> : vector<64x64xf32>
    %40 = tpu.matmul %38, %37, %cst_27 {dimension_numbers = #tpu.dot_dimension_numbers<[0], [0], [1], [1], [0, 1, 1, 1], [], []>} : vector<16x64xf32>, vector<16x64xf32>, vector<64x64xf32> -> vector<64x64xf32>
    %c1 = arith.constant 1 : index
    %c0_28 = arith.constant 0 : index
    %41 = vector.load %arg12[%c1, %c0_28] : memref<2x64xf32, #tpu.memory_space<vmem>>, vector<1x64xf32>
    %cst_29 = arith.constant dense<0xFF800000> : vector<64xf32>
    %42 = vector.multi_reduction <maximumf>, %40, %cst_29 [0] : vector<64x64xf32> to vector<64xf32>
    %43 = vector.shape_cast %42 : vector<64xf32> to vector<1x64xf32>
    %44 = arith.maximumf %41, %43 : vector<1x64xf32>
    %45 = arith.subf %41, %44 : vector<1x64xf32>
    %46 = math.exp %45 : vector<1x64xf32>
    %47 = vector.broadcast %44 : vector<1x64xf32> to vector<64x64xf32>
    %48 = arith.subf %40, %47 : vector<64x64xf32>
    %49 = math.exp %48 : vector<64x64xf32>
    %c1_30 = arith.constant 1 : index
    %c0_31 = arith.constant 0 : index
    %50 = vector.load %arg13[%c1_30, %c0_31] : memref<2x64xf32, #tpu.memory_space<vmem>>, vector<1x64xf32>
    %51 = arith.mulf %46, %50 : vector<1x64xf32>
    %cst_32 = arith.constant dense<0.000000e+00> : vector<64xf32>
    %52 = vector.multi_reduction <add>, %49, %cst_32 [0] : vector<64x64xf32> to vector<64xf32>
    %53 = vector.shape_cast %52 : vector<64xf32> to vector<1x64xf32>
    %54 = arith.addf %51, %53 : vector<1x64xf32>
    %c1_33 = arith.constant 1 : index
    %c0_34 = arith.constant 0 : index
    %55 = vector.load %arg13[%c1_33, %c0_34] : memref<2x64xf32, #tpu.memory_space<vmem>>, vector<1x64xf32>
    tpu.vector_store %arg13[%c1_33, %c0_34], %54 {strides = array<i32>} : memref<2x64xf32, #tpu.memory_space<vmem>>, vector<1x64xf32>,
    %cst_35 = arith.constant dense<0.000000e+00> : vector<16x64xf32>
    %56 = tpu.matmul %39, %49, %cst_35 {dimension_numbers = #tpu.dot_dimension_numbers<[1], [0], [0], [1], [0, 0, 1, 1], [], []>} : vector<16x64xf32>, vector<64x64xf32>, vector<16x64xf32> -> vector<16x64xf32>
    %c16_36 = arith.constant 16 : index
    %c0_37 = arith.constant 0 : index
    %57 = vector.load %arg14[%c16_36, %c0_37] : memref<32x64xf32, #tpu.memory_space<vmem>>, vector<16x64xf32>
    %58 = vector.broadcast %46 : vector<1x64xf32> to vector<16x64xf32>
    %59 = arith.mulf %58, %57 : vector<16x64xf32>
    %60 = arith.addf %59, %56 : vector<16x64xf32>
    %c16_38 = arith.constant 16 : index
    %c0_39 = arith.constant 0 : index
    %61 = vector.load %arg14[%c16_38, %c0_39] : memref<32x64xf32, #tpu.memory_space<vmem>>, vector<16x64xf32>
    tpu.vector_store %arg14[%c16_38, %c0_39], %60 {strides = array<i32>} : memref<32x64xf32, #tpu.memory_space<vmem>>, vector<16x64xf32>,
    %c1_40 = arith.constant 1 : index
    %c0_41 = arith.constant 0 : index
    %62 = vector.load %arg12[%c1_40, %c0_41] : memref<2x64xf32, #tpu.memory_space<vmem>>, vector<1x64xf32>
    tpu.vector_store %arg12[%c1_40, %c0_41], %44 {strides = array<i32>} : memref<2x64xf32, #tpu.memory_space<vmem>>, vector<1x64xf32>,
    %c0_i32_42 = arith.constant 0 : i32
    %63 = arith.cmpi eq, %arg2, %c0_i32_42 : i32
    %64 = arith.extui %63 : i1 to i32
    %c0_i32_43 = arith.constant 0 : i32
    %65 = arith.cmpi ne, %64, %c0_i32_43 : i32
    scf.if %65 {
      %c0_44 = arith.constant 0 : index
      %c0_45 = arith.constant 0 : index
      %66 = vector.load %arg13[%c0_44, %c0_45] : memref<2x64xf32, #tpu.memory_space<vmem>>, vector<1x64xf32>
      %67 = tpu.reciprocal %66 {approx = true} : vector<1x64xf32> -> vector<1x64xf32>
      %c0_46 = arith.constant 0 : index
      %c0_47 = arith.constant 0 : index
      %68 = vector.load %arg14[%c0_46, %c0_47] : memref<32x64xf32, #tpu.memory_space<vmem>>, vector<16x64xf32>
      %69 = vector.broadcast %67 : vector<1x64xf32> to vector<16x64xf32>
      %70 = arith.mulf %68, %69 : vector<16x64xf32>
      %c0_48 = arith.constant 0 : index
      %c0_49 = arith.constant 0 : index
      %71 = vector.load %arg14[%c0_48, %c0_49] : memref<32x64xf32, #tpu.memory_space<vmem>>, vector<16x64xf32>
      tpu.vector_store %arg14[%c0_48, %c0_49], %70 {strides = array<i32>} : memref<32x64xf32, #tpu.memory_space<vmem>>, vector<16x64xf32>,
      %c1_50 = arith.constant 1 : index
      %c0_51 = arith.constant 0 : index
      %72 = vector.load %arg13[%c1_50, %c0_51] : memref<2x64xf32, #tpu.memory_space<vmem>>, vector<1x64xf32>
      %73 = tpu.reciprocal %72 {approx = true} : vector<1x64xf32> -> vector<1x64xf32>
      %c16_52 = arith.constant 16 : index
      %c0_53 = arith.constant 0 : index
      %74 = vector.load %arg14[%c16_52, %c0_53] : memref<32x64xf32, #tpu.memory_space<vmem>>, vector<16x64xf32>
      %75 = vector.broadcast %73 : vector<1x64xf32> to vector<16x64xf32>
      %76 = arith.mulf %74, %75 : vector<16x64xf32>
      %c16_54 = arith.constant 16 : index
      %c0_55 = arith.constant 0 : index
      %77 = vector.load %arg14[%c16_54, %c0_55] : memref<32x64xf32, #tpu.memory_space<vmem>>, vector<16x64xf32>
      tpu.vector_store %arg14[%c16_54, %c0_55], %76 {strides = array<i32>} : memref<32x64xf32, #tpu.memory_space<vmem>>, vector<16x64xf32>,
      %c0_56 = arith.constant 0 : index
      %c0_57 = arith.constant 0 : index
      %78 = vector.load %arg8[%c0_56, %c0_57] : memref<8x32xf32, #tpu.memory_space<vmem>>, vector<8x32xf32>
      %c0_58 = arith.constant 0 : index
      %c0_59 = arith.constant 0 : index
      %79 = vector.load %arg14[%c0_58, %c0_59] : memref<32x64xf32, #tpu.memory_space<vmem>>, vector<32x64xf32>
      %cst_60 = arith.constant dense<0.000000e+00> : vector<8x64xf32>
      %80 = tpu.matmul %78, %79, %cst_60 {dimension_numbers = #tpu.dot_dimension_numbers<[1], [0], [0], [1], [0, 0, 1, 1], [], []>} : vector<8x32xf32>, vector<32x64xf32>, vector<8x64xf32> -> vector<8x64xf32>
      %c0_61 = arith.constant 0 : index
      %c0_62 = arith.constant 0 : index
      %81 = vector.load %arg9[%c0_61, %c0_62] : memref<8x1xf32, #tpu.memory_space<vmem>>, vector<8x1xf32>
      %82 = vector.broadcast %81 : vector<8x1xf32> to vector<8x64xf32>
      %83 = arith.addf %80, %82 : vector<8x64xf32>
      %c0_63 = arith.constant 0 : index
      %c0_64 = arith.constant 0 : index
      %c0_65 = arith.constant 0 : index
      %84 = vector.load %arg10[%c0_63, %c0_64, %c0_65] : memref<1x8x64xf32, #tpu.memory_space<vmem>>, vector<1x8x64xf32>
      %85 = vector.shape_cast %84 : vector<1x8x64xf32> to vector<8x64xf32>
      %86 = vector.shape_cast %83 : vector<8x64xf32> to vector<1x8x64xf32>
      tpu.vector_store %arg10[%c0_63, %c0_64, %c0_65], %86 {strides = array<i32>} : memref<1x8x64xf32, #tpu.memory_space<vmem>>, vector<1x8x64xf32>,
    } else {
    }
    return
  }
  func.func @transform_0(%arg0: i32, %arg1: i32, %arg2: i32) -> (i32, i32, i32) {
    %c0_i32 = arith.constant 0 : i32
    %c0_i32_0 = arith.constant 0 : i32
    return %arg0, %c0_i32, %arg1 : i32, i32, i32
  }
  func.func @transform_1(%arg0: i32, %arg1: i32, %arg2: i32) -> (i32, i32, i32) {
    %c0_i32 = arith.constant 0 : i32
    %c0_i32_0 = arith.constant 0 : i32
    return %arg0, %c0_i32, %arg2 : i32, i32, i32
  }
  func.func @transform_2(%arg0: i32, %arg1: i32, %arg2: i32) -> (i32, i32, i32) {
    %c0_i32 = arith.constant 0 : i32
    %c0_i32_0 = arith.constant 0 : i32
    %c0_i32_1 = arith.constant 0 : i32
    return %arg0, %c0_i32, %c0_i32_0 : i32, i32, i32
  }
  func.func @transform_3(%arg0: i32, %arg1: i32, %arg2: i32) -> (i32, i32) {
    %c0_i32 = arith.constant 0 : i32
    %c0_i32_0 = arith.constant 0 : i32
    %c0_i32_1 = arith.constant 0 : i32
    return %c0_i32, %c0_i32_0 : i32, i32
  }
  func.func @transform_4(%arg0: i32, %arg1: i32, %arg2: i32) -> (i32, i32) {
    %c0_i32 = arith.constant 0 : i32
    %c0_i32_0 = arith.constant 0 : i32
    %c0_i32_1 = arith.constant 0 : i32
    return %c0_i32, %c0_i32_0 : i32, i32
  }
  func.func @transform_5(%arg0: i32, %arg1: i32, %arg2: i32) -> (i32, i32) {
    %c0_i32 = arith.constant 0 : i32
    %c0_i32_0 = arith.constant 0 : i32
    %c0_i32_1 = arith.constant 0 : i32
    return %c0_i32, %c0_i32_0 : i32, i32
  }
  func.func @transform_6(%arg0: i32, %arg1: i32, %arg2: i32) -> (i32, i32) {
    %c0_i32 = arith.constant 0 : i32
    %c0_i32_0 = arith.constant 0 : i32
    %c0_i32_1 = arith.constant 0 : i32
    return %c0_i32, %c0_i32_0 : i32, i32
  }
  func.func @transform_7(%arg0: i32, %arg1: i32, %arg2: i32) -> (i32, i32, i32) {
    %c0_i32 = arith.constant 0 : i32
    %c0_i32_0 = arith.constant 0 : i32
    return %arg0, %c0_i32, %arg1 : i32, i32, i32
  }
}

</mosaic_0001>

<bundles_post_ra>
// kernel: cross_attention_forward.3
= control target key start
LH: loop header
LB: loop body
LE: loop exit
PB: predicated region body
PF: predicated region fallthrough
CT: control target
= control target key end

     0   :  { %s627_s21 = smov 0   ;;  %s629_s22 = smov 0   ;;  %s684_s0 = inlined_call_operand.vmem [shape: f32[16,8,8], index: 0, kind: input, shape index: {}]   ;;  %s685_s1 = inlined_call_operand.vmem [shape: f32[16,8,8], index: 1, kind: input, shape index: {}]   ;;  %s686_s2 = inlined_call_operand.vmem [shape: f32[8,1], index: 2, kind: input, shape index: {}]   ;;  %s687_s3 = inlined_call_operand.vmem [shape: f32[8,1], index: 3, kind: input, shape index: {}]   ;;  %s688_s4 = inlined_call_operand.vmem [shape: f32[8,8], index: 4, kind: input, shape index: {}]   ;;  %s689_s5 = inlined_call_operand.vmem [shape: f32[8,1], index: 5, kind: input, shape index: {}]   ;;  %s690_s6 = inlined_call_operand.vmem [shape: f32[16,8,8], index: 6, kind: output, shape index: {}]  }
   0x1   :  { %s631_s23 = smov 0  }
   0x2 LB: > { %s28_s24 = sadd.s32 1, %s583_s22  ;;  %p520_p0 = scmp.ge.s32.totalorder %s587_s23, 1  ;;  %s587_s23 = sphi %s631_s23, %s16_s23   ;;  %s583_s22 = sphi %s629_s22, %s692_s22   ;;  %s579_s21 = sphi %s627_s21, %s691_s21  }
   0x3   : > { %p30_p1 = scmp.ge.s32.totalorder %s28_s24, 16  ;;  %p244_p2 = scmp.lt.s32.totalorder %s587_s23, 17 }
   0x5   : > { %s694_s24 = smov (%p30_p1, %s28_s24), 0  ;;  %p245_p3 = pnand %p520_p0, %p244_p2 }
   0x6   : > { %p285_p4 = scmp.lt.s32.totalorder (!%p245_p3), %s579_s21, 15 }
   0x7   : > { %248 = sbr.rel (%p245_p3) target bundleno = 343 (0x157), region = 44 }
   0xc   : > { %v330_v0 = vld [vmem:[%s686_s2] sm:$0xff]  ;;  %v589_v1 = vmov 0   ;;  %v590_v3 = vmov 0.0   ;;  %vm591_vm0 = vmmov 0   ;;  %s696_s21 = smov (!%p285_p4, %s579_s21), 15  ;;  %vm307_vm1 = vcmask 64512  }
   0xd   : > { %561 = vset.pattern.permute.xlu0 %v589_v1  ;;  %562 = vset.pattern.permute.xlu1 %v589_v1  ;;  %v337_v2 = vld [vmem:[%s687_s3] sm:$0xff]  ;;  %s654_s7 = sshll.u32 %s696_s21, 3 }
   0xe   : > { %333 = vperm.xlu0 %561, %v330_v0   ;;  %529 = vmatprep.subr.mxu0 %v590_v3  ;;  %v345_v4 = vld [vmem:[%s689_s5] sm:$0xff]  ;;  %s291_s10 = scalar_lea.vmem %s684_s0, %s654_s7  ;;  %s298_s15 = scalar_lea.vmem %s685_s1, %s654_s7 }
   0xf   : > { %531 = vmatprep.mubr.msk.f32.mxu0 %vm591_vm0, %v590_v3  ;;  %348 = vperm.xlu1 %562, %v345_v4   ;;  %v306_v5 = vld [vmem:[%s291_s10] sm:$0xff]  ;;  %s305_s18 = scalar_lea.vmem %s690_s6, %s654_s7 }
  0x10   : > { %v308_v6 = vsel %vm307_vm1, %v306_v5, 0.0  ;;  %v344_v31 = vld [vmem:[%s688_s4] sm:$0xff] }
  0x11   : > { %v309_v7 = vrot.slane %v308_v6, 4  ;;  %v424_v34 = vld [vmem:[%s298_s15] sm:$0xff] }
  0x12   : > { %340 = vperm.xlu0 %561, %v337_v2  }
  0x13   : > { %v310_v8 = vadd.f32 %v309_v7, %v308_v6 }
  0x15   : > { %v311_v9 = vrot.slane %v310_v8, 2 }
  0x17   : > { %v312_v10 = vadd.f32 %v311_v9, %v310_v8 }
  0x19   : > { %v313_v11 = vrot.slane %v312_v10, 1 }
  0x1b   : > { %v314_v12 = vadd.f32 %v313_v11, %v312_v10 }
  0x1d   : > { %v316_v13 = vmul.f32 0.125, %v314_v12 }
  0x1f   : > { %v317_v14 = vsub.f32 %v306_v5, %v316_v13 }
  0x21   : > { %v318_v15 = vmul.f32 %v317_v14, %v317_v14 }
  0x23   : > { %v319_v16 = vsel %vm307_vm1, %v318_v15, 0.0 }
  0x24   : > { %v320_v17 = vrot.slane %v319_v16, 4 }
  0x26   : > { %v321_v18 = vadd.f32 %v320_v17, %v319_v16 }
  0x28   : > { %v322_v19 = vrot.slane %v321_v18, 2 }
  0x2a   : > { %v323_v20 = vadd.f32 %v322_v19, %v321_v18 }
  0x2c   : > { %v324_v21 = vrot.slane %v323_v20, 1 }
  0x2e   : > { %v325_v22 = vadd.f32 %v324_v21, %v323_v20 }
  0x30   : > { %v326_v23 = vmul.f32 0.125, %v325_v22 }
  0x32   : > { %v327_v24 = vadd.f32 1e-05, %v326_v23 }
  0x34   : > { %563 = vrsqrt.f32 %v327_v24 }
  0x41   : > { %v564_v25 = vpop.eup %563 }
  0x42   : > { %v329_v26 = vmul.f32 %v564_v25, %v317_v14 }
  0x89   : > { %v334_v27 = vpop.permute.xlu0 %333 }
  0x8a   : > { %v336_v28 = vmul.f32 %v334_v27, %v329_v26  ;;  %v349_v32 = vpop.permute.xlu1 %348 }
  0x8d   : > { %v341_v29 = vpop.permute.xlu0 %340 }
  0x8e   : > { %v343_v30 = vadd.f32 %v341_v29, %v336_v28 }
  0x90   : > { %530 = vmatpush3.msra.mxu0 %v343_v30 }
  0x91   : > { %532 = vmatmul.mubr.msk.f32.vlgmr.msra.gmra.mxu0 %vm307_vm1, %v344_v31 }
 0x151   : > { %v420_v33 = vpop.f32.mrf.mxu0 }
 0x152   : > { %v421_v35 = vadd.f32 %v420_v33, %v349_v32 }
 0x153   : > { %v533_v36 = vpop.f32.mrf.mxu0 }
 0x154   : > { %v425_v37 = vadd.f32 %v424_v34, %v421_v35 }
 0x156   : > { %426 = vst.msk [vmem:[%s305_s18] sm:$0xff] %vm307_vm1, %v425_v37 }
 0x157 PF: > { %s16_s23 = sadd.s32 1, %s587_s23   ;;  %s691_s21 = smov %s583_s22 }
 0x158   : > { %p13_p5 = scmp.ge.s32.totalorder %s16_s23, 18   ;;  %s692_s22 = smov %s694_s24 }
 0x15a   :  { %15 = sbr.rel (!%p13_p5) target bundleno = 2 (0x2), region = 77 }

// kernel: cross_attention_forward.2
= control target key start
LH: loop header
LB: loop body
LE: loop exit
PB: predicated region body
PF: predicated region fallthrough
CT: control target
= control target key end

     0   :  { %s1865_s24 = smov 0   ;;  %s1867_s25 = smov 0   ;;  %s2065_s0 = inlined_call_operand.vmem [shape: f32[2,8,64], index: 0, kind: input, shape index: {}, may-alias: {0,1}]   ;;  %s2066_s1 = inlined_call_operand.vmem [shape: f32[2,8,64], index: 1, kind: input, shape index: {}, may-alias: {0,1}]   ;;  %s2067_s2 = inlined_call_operand.vmem [shape: f32[2,8,1], index: 2, kind: input, shape index: {}]   ;;  %s2068_s3 = inlined_call_operand.vmem [shape: f32[32,8], index: 3, kind: input, shape index: {}]   ;;  %s2069_s4 = inlined_call_operand.vmem [shape: f32[64,8], index: 4, kind: input, shape index: {}]   ;;  %s2070_s5 = inlined_call_operand.vmem [shape: f32[8,32], index: 5, kind: input, shape index: {}]   ;;  %s2071_s6 = inlined_call_operand.vmem [shape: f32[8,1], index: 6, kind: input, shape index: {}]   ;;  %s2072_s7 = inlined_call_operand.vmem [shape: f32[2,8,64], index: 7, kind: output, shape index: {}]  }
   0x1   :  { %s1869_s26 = smov 0  }
   0x2 LB: > { %s36_s27 = sadd.s32 1, %s1815_s25  ;;  %p1525_p0 = scmp.ge.s32.totalorder %s1819_s26, 1  ;;  %s1819_s26 = sphi %s1869_s26, %s17_s26   ;;  %s1815_s25 = sphi %s1867_s25, %s2074_s25   ;;  %s1811_s24 = sphi %s1865_s24, %s2073_s24  }
   0x3   : > { %p38_p1 = scmp.ge.s32.totalorder %s36_s27, 2  ;;  %p285_p2 = scmp.lt.s32.totalorder %s1819_s26, 3 }
   0x5   : > { %s2076_s27 = smov (%p38_p1, %s36_s27), 0  ;;  %p286_p3 = pnand %p1525_p0, %p285_p2 }
   0x6   : > { %p332_p4 = scmp.lt.s32.totalorder (!%p286_p3), %s1811_s24, 1 }
   0x7   : > { %289 = sbr.rel (%p286_p3) target bundleno = 1428 (0x594), region = 48 }
   0xc   : > { %v1821_v0 = vmov 0   ;;  %s2078_s24 = smov (!%p332_p4, %s1811_s24), 1  ;;  %vm373_vm0 = vcmask 64512   ;;  %v491_v1 = vld [vmem:[%s2069_s4] sm:$0xff]  ;;  %v492_v8 = vld [vmem:[%s2069_s4 + $0x8] sm:$0xff]  ;;  %v493_v12 = vld [vmem:[%s2069_s4 + $0x10] sm:$0xff] }
   0xd   : > { %1755 = vset.pattern.permute.xlu0 %v1821_v0  ;;  %s1883_s28 = sshll.u32 %s2078_s24, 3  ;;  %1634 = vmatprep.mubr.msk.f32.mxu1 %vm373_vm0, %v491_v1  ;;  %v369_v3 = vld [vmem:[%s2068_s3] sm:$0xff]  ;;  %v370_v11 = vld [vmem:[%s2068_s3 + $0x8] sm:$0xff]  ;;  %v494_v13 = vld [vmem:[%s2069_s4 + $0x18] sm:$0xff]  ;;  %vm471_vm1 = vcmask 523264   ;;  %vm663_vm2 = vcmask 130048  }
   0xe   : > { %s349_s8 = scalar_lea.vmem %s2067_s2, %s1883_s28  ;;  %1626 = vmatprep.mubr.msk.f32.mxu0 %vm373_vm0, %v369_v3  ;;  %s345_s15 = scalar_lea.vmem %s2066_s1, %s1883_s28  ;;  %v371_v14 = vld [vmem:[%s2068_s3 + $0x10] sm:$0xff]  ;;  %v372_v15 = vld [vmem:[%s2068_s3 + $0x18] sm:$0xff]  ;;  %v495_v22 = vld [vmem:[%s2069_s4 + $0x20] sm:$0xff]  ;;  %vm476_vm3 = vcmask 517120   ;;  %v1822_v36 = vmov -inf   ;;  %v1823_v37 = vmov 0.0   ;;  %v820_v3 = vlaneseq }
   0xf   : > { %v484_v2 = vld [vmem:[%s349_s8] sm:$0xff]  ;;  %s338_s18 = scalar_lea.vmem %s2065_s0, %s1883_s28  ;;  %v496_v23 = vld [vmem:[%s2069_s4 + $0x28] sm:$0xff]  ;;  %477 = vst.msk [vmem:[#allocation3] sm:$0x3] %vm476_vm3, %v1822_v36  ;;  %478 = vst.msk [vmem:[#allocation4] sm:$0x3] %vm476_vm3, %v1823_v37  ;;  %s356_s30 = scalar_lea.vmem %s2072_s7, %s1883_s28 }
  0x10   : > { %487 = vperm.xlu0 %1755, %v484_v2   ;;  %v483_v4 = vld [vmem:[%s345_s15] sm:$0xff]  ;;  %480 = vst.msk [vmem:[#allocation5 + $0x8] sm:$0xff] %vm471_vm1, %v1823_v37  ;;  %479 = vst.msk [vmem:[#allocation5] sm:$0xff] %vm471_vm1, %v1823_v37  ;;  %v497_v38 = vld [vmem:[%s2069_s4 + $0x30] sm:$0xff]  ;;  %vm872_vm4 = vcmask 516096   ;;  %vm1824_vm5 = vmmov 0  }
  0x11   : > { %v361_v7 = vld [vmem:[%s338_s18] sm:$0xff]  ;;  %481 = vst.msk [vmem:[#allocation5 + $0x10] sm:$0xff] %vm471_vm1, %v1823_v37  ;;  %482 = vst.msk [vmem:[#allocation5 + $0x18] sm:$0xff] %vm471_vm1, %v1823_v37  ;;  %v498_v40 = vld [vmem:[%s2069_s4 + $0x38] sm:$0xff]  ;;  %vm1342_vm6 = vcmask 261120  }
  0x14   : > { %365 = vperm.xlu0 %1755, %v484_v2  }
  0x8b   : > { %v488_v5 = vpop.permute.xlu0 %487 }
  0x8c   : > { %v490_v6 = vadd.f32 %v488_v5, %v483_v4 }
  0x8e   : > { %1632 = vmatprep.subr.mxu1 %v490_v6 }
  0x8f   : > { %v366_v9 = vpop.permute.xlu0 %365  ;;  %1633 = vmatpush3.msra.mxu1 %v490_v6  ;;  %v821_v6 = vshrl.u32 %v820_v3, 7 }
  0x90   : > { %v368_v10 = vadd.f32 %v366_v9, %v361_v7  ;;  %1635 = vmatmul.mubr.msk.f32.vlgmr.msra.gmra.mxu1 %vm373_vm0, %v492_v8  ;;  %v1977_v8 = vld [vmem:[#allocation3] sm:$0x1] }
  0x91   : > { %1637 = vmatprep.mubr.msk.f32.mxu1 %vm373_vm0, %v493_v12 }
  0x92   : > { %1624 = vmatprep.subr.mxu0 %v368_v10 }
  0x93   : > { %1625 = vmatpush3.msra.mxu0 %v368_v10  ;;  %v1979_v10 = vsub.s32 0, %v821_v6 }
  0x94   : > { %1627 = vmatmul.mubr.msk.f32.vlgmr.msra.gmra.mxu0 %vm373_vm0, %v370_v11  ;;  %1638 = vmatmul.mubr.msk.f32.gmra.mxu1 %vm373_vm0, %v494_v13 }
  0x95   : > { %1629 = vmatprep.mubr.msk.f32.mxu0 %vm373_vm0, %v371_v14  ;;  %1640 = vmatprep.mubr.msk.f32.mxu1 %vm373_vm0, %v495_v22 }
  0x98   : > { %1630 = vmatmul.mubr.msk.f32.gmra.mxu0 %vm373_vm0, %v372_v15  ;;  %1641 = vmatmul.mubr.msk.f32.gmra.mxu1 %vm373_vm0, %v496_v23 }
  0x99   : > { %1643 = vmatprep.mubr.msk.f32.mxu1 %vm373_vm0, %v497_v38 }
  0x9c   : > { %1644 = vmatmul.mubr.msk.f32.gmra.mxu1 %vm373_vm0, %v498_v40 }
 0x150   : > { %v1636_v16 = vpop.f32.mrf.mxu1 }
 0x152   : > { %v590_v17 = vpop.f32.mrf.mxu1 }
 0x153   : > { %631 = vxpose.xlu1.b32.start [1/2] (short) (narrow) %v590_v17, 64 }
 0x154   : > { %v1628_v18 = vpop.f32.mrf.mxu0  ;;  %v1639_v24 = vpop.f32.mrf.mxu1 }
 0x155   : > { %473 = vst.msk [vmem:[#allocation2 + $0x8] sm:$0xff] %vm471_vm1, %v1628_v18 }
 0x156   : > { %v452_v19 = vpop.f32.mrf.mxu0  ;;  %v600_v25 = vpop.f32.mrf.mxu1 }
 0x157   : > { %632 = vxpose.xlu1.b32.end [2/2] (short) (narrow) %v1636_v16, 64  ;;  %472 = vst.msk [vmem:[#allocation2] sm:$0xff] %vm471_vm1, %v452_v19  ;;  %970 = vxpose.xlu0.b32.start [1/2] (short) (narrow) %v600_v25, 64 }
 0x158   : > { %v1631_v34 = vpop.f32.mrf.mxu0  ;;  %v1962_v39 = vpop.f32.mrf.mxu1 }
 0x159   : > { %475 = vst.msk [vmem:[#allocation2 + $0x18] sm:$0xff] %vm471_vm1, %v1631_v34 }
 0x15a   : > { %v462_v35 = vpop.f32.mrf.mxu0  ;;  %v610_v41 = vpop.f32.mrf.mxu1 }
 0x15b   : > { %971 = vxpose.xlu0.b32.end [2/2] (short) (narrow) %v1639_v24, 64  ;;  %474 = vst.msk [vmem:[#allocation2 + $0x10] sm:$0xff] %vm471_vm1, %v462_v35  ;;  %1678 = vmatprep.mubr.msk.f32.mxu1 %vm471_vm1, %v610_v41 }
 0x15c   : > { %v630_v20 = vld [vmem:[#allocation2 + $0x8] sm:$0xff] }
 0x15d   : > { %1646 = vmatprep.subr.mxu0 %v630_v20 }
 0x15e   : > { %1647 = vmatpush3.msra.mxu0 %v630_v20  ;;  %v629_v21 = vld [vmem:[#allocation2] sm:$0xff] }
 0x15f   : > { %1648 = vmatprep.subr.mxu0 %v629_v21 }
 0x160   : > { %1649 = vmatpush3.msra.mxu0 %v629_v21 }
 0x175   : > { %1756 = vset.pattern.permute.xlu1 %v1821_v0 }
 0x1cf   : > { %v647_v26 = vpop.trf.xlu1 }
 0x1d0   : > { %1650 = vmatprep.mubr.msk.f32.mxu0 %vm663_vm2, %v647_v26 }
 0x1d3   : > { %v648_v27 = vpop.trf.xlu1  ;;  %v986_v26 = vpop.trf.xlu0 }
 0x1d4   : > { %1651 = vmatmul.mubr.msk.f32.vlgmr.msra.gmra.mxu0 %vm663_vm2, %v648_v27 }
 0x1d7   : > { %v649_v28 = vpop.trf.xlu1 }
 0x1d8   : > { %1653 = vmatprep.mubr.msk.f32.mxu0 %vm663_vm2, %v649_v28 }
 0x1db   : > { %v650_v29 = vpop.trf.xlu1 }
 0x1dc   : > { %1654 = vmatmul.mubr.msk.f32.gmra.mxu0 %vm663_vm2, %v650_v29 }
 0x1df   : > { %v651_v30 = vpop.trf.xlu1 }
 0x1e0   : > { %1656 = vmatprep.mubr.msk.f32.mxu0 %vm663_vm2, %v651_v30  ;;  %v987_v30 = vpop.trf.xlu0 }
 0x1e3   : > { %v652_v31 = vpop.trf.xlu1 }
 0x1e4   : > { %1657 = vmatmul.mubr.msk.f32.gmra.mxu0 %vm663_vm2, %v652_v31 }
 0x1e7   : > { %v653_v32 = vpop.trf.xlu1 }
 0x1e8   : > { %1659 = vmatprep.mubr.msk.f32.mxu0 %vm663_vm2, %v653_v32  ;;  %v988_v32 = vpop.trf.xlu0 }
 0x1eb   : > { %v654_v33 = vpop.trf.xlu1 }
 0x1ec   : > { %1660 = vmatmul.mubr.msk.f32.gmra.mxu0 %vm663_vm2, %v654_v33  ;;  %v989_v41 = vpop.trf.xlu0 }
 0x294   : > { %v1652_v42 = vpop.f32.mrf.mxu0 }
 0x295   : > { %v796_v55 = vsel %vm471_vm1, %v1652_v42, -inf }
 0x296   : > { %v754_v43 = vpop.f32.mrf.mxu0 }
 0x297   : > { %v795_v50 = vsel %vm471_vm1, %v754_v43, -inf }
 0x29c   : > { %v1655_v44 = vpop.f32.mrf.mxu0 }
 0x29d   : > { %v798_v56 = vsel %vm471_vm1, %v1655_v44, -inf }
 0x29e   : > { %v764_v45 = vpop.f32.mrf.mxu0 }
 0x29f   : > { %v797_v57 = vsel %vm471_vm1, %v764_v45, -inf }
 0x2a4   : > { %v1658_v46 = vpop.f32.mrf.mxu0 }
 0x2a5   : > { %v801_v51 = vsel %vm471_vm1, %v1658_v46, -inf }
 0x2a6   : > { %v774_v47 = vpop.f32.mrf.mxu0  ;;  %v802_v59 = vmax.f32 %v796_v55, %v801_v51 }
 0x2a7   : > { %v799_v48 = vsel %vm471_vm1, %v774_v47, -inf }
 0x2a8   : > { %v800_v53 = vmax.f32 %v795_v50, %v799_v48  ;;  %v990_v50 = vpop.trf.xlu0 }
 0x2aa   : > { %v807_v62 = vmax.f32 %v800_v53, %v802_v59  ;;  %v968_v59 = vld [vmem:[#allocation2 + $0x10] sm:$0xff] }
 0x2ac   : > { %v1661_v49 = vpop.f32.mrf.mxu0 }
 0x2ad   : > { %v805_v52 = vsel %vm471_vm1, %v1661_v49, -inf }
 0x2ae   : > { %v784_v54 = vpop.f32.mrf.mxu0  ;;  %v806_v60 = vmax.f32 %v798_v56, %v805_v52  ;;  %v969_v56 = vld [vmem:[#allocation2 + $0x18] sm:$0xff] }
 0x2af   : > { %v803_v58 = vsel %vm471_vm1, %v784_v54, -inf }
 0x2b0   : > { %v804_v61 = vmax.f32 %v797_v57, %v803_v58 }
 0x2b2   : > { %v808_v63 = vmax.f32 %v804_v61, %v806_v60  ;;  %v991_v60 = vpop.trf.xlu0 }
 0x2b4   : > { %v809_v0 = vmax.f32 %v807_v62, %v808_v63 }
 0x2b6   : > { %v810_v1 = vrot.slane %v809_v0, 4 }
 0x2b8   : > { %v811_v2 = vmax.f32 %v809_v0, %v810_v1  ;;  %v992_v1 = vpop.trf.xlu0 }
 0x2ba   : > { %v812_v4 = vrot.slane %v811_v2, 2 }
 0x2bc   : > { %v813_v5 = vmax.f32 %v811_v2, %v812_v4  ;;  %v993_v6 = vpop.trf.xlu0 }
 0x2be   : > { %v814_v7 = vrot.slane %v813_v5, 1 }
 0x2c0   : > { %v815_v9 = vmax.f32 %v813_v5, %v814_v7  ;;  %v848_v5 = vld [vmem:[#allocation4] sm:$0x1] }
 0x2c2   : > { %v816_v11 = vmax.f32 %v1977_v8, %v815_v9 }
 0x2c4   : > { %v823_v12 = vrot.slane %v816_v11, %v1979_v10  ;;  %967 = vst.msk [vmem:[#allocation3] sm:$0x1] %vm872_vm4, %v816_v11 }
 0x2c6   : > { %v830_v13 = vsub.f32 %v784_v54, %v823_v12  ;;  %v831_v14 = vsub.f32 %v1661_v49, %v823_v12  ;;  %v829_v15 = vsub.f32 %v1658_v46, %v823_v12  ;;  %v828_v16 = vsub.f32 %v774_v47, %v823_v12 }
 0x2c7   : > { %v826_v17 = vsub.f32 %v764_v45, %v823_v12  ;;  %v825_v20 = vsub.f32 %v1652_v42, %v823_v12  ;;  %v824_v22 = vsub.f32 %v754_v43, %v823_v12  ;;  %v827_v24 = vsub.f32 %v1655_v44, %v823_v12  ;;  %v2004_v12 = vpop.f32.mrf.mxu1 }
 0x2c8   : > { %v844_v18 = vmul.f32 1.442695, %v830_v13  ;;  %v846_v19 = vmul.f32 1.442695, %v831_v14  ;;  %v842_v21 = vmul.f32 1.442695, %v829_v15  ;;  %v817_v45 = vsub.f32 %v1977_v8, %v816_v11 }
 0x2c9   : > { %v840_v23 = vmul.f32 1.442695, %v828_v16  ;;  %v836_v25 = vmul.f32 1.442695, %v826_v17  ;;  %v834_v27 = vmul.f32 1.442695, %v825_v20  ;;  %v620_v13 = vpop.f32.mrf.mxu1 }
 0x2ca   : > { %1757 = vpow2.f32 %v846_v19  ;;  %v832_v28 = vmul.f32 1.442695, %v824_v22  ;;  %v838_v29 = vmul.f32 1.442695, %v827_v24  ;;  %v818_v51 = vmul.f32 1.442695, %v817_v45  ;;  %1713 = vmatprep.mubr.msk.f32.mxu0 %vm471_vm1, %v620_v13 }
 0x2cb   : > { %1759 = vpow2.f32 %v844_v18  ;;  %v956_v16 = vld [vmem:[#allocation5 + $0x8] sm:$0xff]  ;;  %v955_v17 = vld [vmem:[#allocation5] sm:$0xff] }
 0x2cc   : > { %1761 = vpow2.f32 %v842_v21 }
 0x2cd   : > { %1763 = vpow2.f32 %v840_v23 }
 0x2ce   : > { %1765 = vpow2.f32 %v836_v25 }
 0x2cf   : > { %1767 = vpow2.f32 %v834_v27 }
 0x2d0   : > { %1769 = vpow2.f32 %v832_v28 }
 0x2d1   : > { %1771 = vpow2.f32 %v838_v29 }
 0x2d2   : > { %1773 = vpow2.f32 %v818_v51 }
 0x2d7   : > { %v1758_v31 = vpop.eup %1757 }
 0x2d8   : > { %v1760_v33 = vpop.eup %1759  ;;  %1662 = vmatprep.subr.mxu1 %v1758_v31  ;;  %v863_v62 = vsel %vm471_vm1, %v1758_v31, 0.0 }
 0x2d9   : > { %v1762_v34 = vpop.eup %1761  ;;  %1663 = vmatpush3.msra.mxu1 %v1758_v31  ;;  %v861_v58 = vsel %vm471_vm1, %v1760_v33, 0.0 }
 0x2da   : > { %v1764_v35 = vpop.eup %1763  ;;  %1664 = vmatprep.subr.mxu1 %v1760_v33  ;;  %v859_v55 = vsel %vm471_vm1, %v1762_v34, 0.0 }
 0x2db   : > { %v1766_v36 = vpop.eup %1765  ;;  %1665 = vmatpush3.msra.mxu1 %v1760_v33  ;;  %v857_v53 = vsel %vm471_vm1, %v1764_v35, 0.0 }
 0x2dc   : > { %v1768_v38 = vpop.eup %1767  ;;  %1666 = vmatprep.subr.mxu1 %v1762_v34  ;;  %v853_v47 = vsel %vm471_vm1, %v1766_v36, 0.0 }
 0x2dd   : > { %v1770_v40 = vpop.eup %1769  ;;  %1667 = vmatpush3.msra.mxu1 %v1762_v34  ;;  %v851_v42 = vsel %vm471_vm1, %v1768_v38, 0.0 }
 0x2de   : > { %1668 = vmatprep.subr.mxu1 %v1764_v35  ;;  %v850_v43 = vsel %vm471_vm1, %v1770_v40, 0.0  ;;  %v1772_v44 = vpop.eup %1771 }
 0x2df   : > { %1669 = vmatpush3.msra.mxu1 %v1764_v35  ;;  %v852_v46 = vadd.f32 %v851_v42, %v850_v43  ;;  %v855_v49 = vsel %vm471_vm1, %v1772_v44, 0.0  ;;  %v1774_v4 = vpop.eup %1773 }
 0x2e0   : > { %1670 = vmatprep.subr.mxu1 %v1772_v44  ;;  %v849_v8 = vmul.f32 %v1774_v4, %v848_v5  ;;  %v960_v15 = vrot.slane %v1774_v4, %v1979_v10 }
 0x2e1   : > { %1671 = vmatpush3.msra.mxu1 %v1772_v44  ;;  %v854_v48 = vadd.f32 %v853_v47, %v852_v46 }
 0x2e2   : > { %1672 = vmatprep.subr.mxu1 %v1766_v36  ;;  %v962_v18 = vmul.f32 %v960_v15, %v956_v16  ;;  %v961_v21 = vmul.f32 %v960_v15, %v955_v17 }
 0x2e3   : > { %1673 = vmatpush3.msra.mxu1 %v1766_v36  ;;  %v856_v52 = vadd.f32 %v855_v49, %v854_v48 }
 0x2e4   : > { %1674 = vmatprep.subr.mxu1 %v1768_v38 }
 0x2e5   : > { %1675 = vmatpush3.msra.mxu1 %v1768_v38  ;;  %v858_v54 = vadd.f32 %v857_v53, %v856_v52 }
 0x2e6   : > { %1676 = vmatprep.subr.mxu1 %v1770_v40 }
 0x2e7   : > { %1677 = vmatpush3.msra.mxu1 %v1770_v40  ;;  %v860_v57 = vadd.f32 %v859_v55, %v858_v54 }
 0x2e8   : > { %1679 = vmatmul.mubr.msk.f32.vlgmr.msra.gmra.mxu1 %vm471_vm1, %v1962_v39  ;;  %1681 = vmatprep.subr.mxu1 %v969_v56 }
 0x2e9   : > { %1682 = vmatpush3.msra.mxu1 %v969_v56  ;;  %1685 = vmatprep.mubr.msk.f32.mxu1 %vm663_vm2, %v986_v26  ;;  %v862_v61 = vadd.f32 %v861_v58, %v860_v57 }
 0x2ea   : > { %1683 = vmatprep.subr.mxu1 %v968_v59 }
 0x2eb   : > { %1684 = vmatpush3.msra.mxu1 %v968_v59  ;;  %v864_v63 = vadd.f32 %v863_v62, %v862_v61 }
 0x2ec   : > { %1686 = vmatmul.mubr.msk.f32.vlgmr.msra.gmra.mxu1 %vm663_vm2, %v987_v30 }
 0x2ed   : > { %1688 = vmatprep.mubr.msk.f32.mxu1 %vm663_vm2, %v988_v32  ;;  %v865_v0 = vrot.slane %v864_v63, 4 }
 0x2ef   : > { %v866_v2 = vadd.f32 %v865_v0, %v864_v63 }
 0x2f0   : > { %1689 = vmatmul.mubr.msk.f32.gmra.mxu1 %vm663_vm2, %v989_v41 }
 0x2f1   : > { %1691 = vmatprep.mubr.msk.f32.mxu1 %vm663_vm2, %v990_v50  ;;  %v867_v39 = vrot.slane %v866_v2, 2 }
 0x2f3   : > { %v868_v3 = vadd.f32 %v867_v39, %v866_v2 }
 0x2f4   : > { %1692 = vmatmul.mubr.msk.f32.gmra.mxu1 %vm663_vm2, %v991_v60  ;;  %v1131_v60 = vld [vmem:[#allocation3 + $0x1] sm:$0x1] }
 0x2f5   : > { %1694 = vmatprep.mubr.msk.f32.mxu1 %vm663_vm2, %v992_v1  ;;  %v869_v7 = vrot.slane %v868_v3, 1 }
 0x2f7   : > { %v870_v9 = vadd.f32 %v869_v7, %v868_v3 }
 0x2f8   : > { %1695 = vmatmul.mubr.msk.f32.gmra.mxu1 %vm663_vm2, %v993_v6 }
 0x2f9   : > { %v871_v11 = vadd.f32 %v870_v9, %v849_v8 }
 0x2fb   : > { %873 = vst.msk [vmem:[#allocation4] sm:$0x1] %vm872_vm4, %v871_v11 }
 0x302   : > { %v1307_v14 = vld [vmem:[#allocation4] sm:$0x1] }
 0x303   : > { %1775 = vrcp.f32 %v1307_v14 }
 0x310   : > { %v1776_v25 = vpop.eup %1775 }
 0x311   : > { %v1314_v28 = vrot.slane %v1776_v25, %v1979_v10 }
 0x3a8   : > { %v1680_v19 = vpop.f32.mrf.mxu1 }
 0x3a9   : > { %v964_v20 = vadd.f32 %v1680_v19, %v962_v18 }
 0x3aa   : > { %v946_v22 = vpop.f32.mrf.mxu1 }
 0x3ab   : > { %966 = vst.msk [vmem:[#allocation5 + $0x8] sm:$0xff] %vm471_vm1, %v964_v20  ;;  %v963_v23 = vadd.f32 %v961_v21, %v946_v22 }
 0x3ac   : > { %v1687_v24 = vpop.f32.mrf.mxu1 }
 0x3ad   : > { %965 = vst.msk [vmem:[#allocation5] sm:$0xff] %vm471_vm1, %v963_v23  ;;  %v1133_v45 = vsel %vm471_vm1, %v1687_v24, -inf }
 0x3ae   : > { %v1092_v26 = vpop.f32.mrf.mxu1 }
 0x3af   : > { %v1132_v40 = vsel %vm471_vm1, %v1092_v26, -inf }
 0x3b0   : > { %v1690_v27 = vpop.f32.mrf.mxu1 }
 0x3b1   : > { %v1135_v46 = vsel %vm471_vm1, %v1690_v27, -inf }
 0x3b2   : > { %v1310_v29 = vld [vmem:[#allocation5 + $0x8] sm:$0xff]  ;;  %v1102_v30 = vpop.f32.mrf.mxu1 }
 0x3b3   : > { %v1316_v31 = vmul.f32 %v1314_v28, %v1310_v29  ;;  %v1134_v47 = vsel %vm471_vm1, %v1102_v30, -inf }
 0x3b4   : > { %v1309_v32 = vld [vmem:[#allocation5] sm:$0xff]  ;;  %v1693_v33 = vpop.f32.mrf.mxu1 }
 0x3b5   : > { %1318 = vst.msk [vmem:[#allocation5 + $0x8] sm:$0xff] %vm471_vm1, %v1316_v31  ;;  %v1315_v34 = vmul.f32 %v1314_v28, %v1309_v32  ;;  %v1138_v41 = vsel %vm471_vm1, %v1693_v33, -inf }
 0x3b6   : > { %v1112_v35 = vpop.f32.mrf.mxu1  ;;  %v1139_v49 = vmax.f32 %v1133_v45, %v1138_v41 }
 0x3b7   : > { %1317 = vst.msk [vmem:[#allocation5] sm:$0xff] %vm471_vm1, %v1315_v34  ;;  %v1136_v36 = vsel %vm471_vm1, %v1112_v35, -inf }
 0x3b8   : > { %v1696_v38 = vpop.f32.mrf.mxu1  ;;  %v1137_v43 = vmax.f32 %v1132_v40, %v1136_v36 }
 0x3b9   : > { %v1142_v42 = vsel %vm471_vm1, %v1696_v38, -inf }
 0x3ba   : > { %v1122_v44 = vpop.f32.mrf.mxu1  ;;  %v1143_v50 = vmax.f32 %v1135_v46, %v1142_v42  ;;  %v1144_v52 = vmax.f32 %v1137_v43, %v1139_v49  ;;  %v1185_v49 = vld [vmem:[#allocation4 + $0x1] sm:$0x1] }
 0x3bb   : > { %v1140_v48 = vsel %vm471_vm1, %v1122_v44, -inf }
 0x3bc   : > { %v1141_v51 = vmax.f32 %v1134_v47, %v1140_v48 }
 0x3be   : > { %v1145_v53 = vmax.f32 %v1141_v51, %v1143_v50 }
 0x3c0   : > { %v1146_v54 = vmax.f32 %v1144_v52, %v1145_v53 }
 0x3c2   : > { %v1147_v55 = vrot.slane %v1146_v54, 4 }
 0x3c4   : > { %v1148_v56 = vmax.f32 %v1146_v54, %v1147_v55 }
 0x3c6   : > { %v1149_v57 = vrot.slane %v1148_v56, 2 }
 0x3c8   : > { %v1150_v58 = vmax.f32 %v1148_v56, %v1149_v57  ;;  %v1292_v56 = vld [vmem:[#allocation5 + $0x18] sm:$0xff]  ;;  %v1291_v57 = vld [vmem:[#allocation5 + $0x10] sm:$0xff] }
 0x3ca   : > { %v1151_v59 = vrot.slane %v1150_v58, 1 }
 0x3cc   : > { %v1152_v61 = vmax.f32 %v1150_v58, %v1151_v59 }
 0x3ce   : > { %v1153_v62 = vmax.f32 %v1131_v60, %v1152_v61 }
 0x3d0   : > { %v1160_v63 = vrot.slane %v1153_v62, %v1979_v10  ;;  %1303 = vst.msk [vmem:[#allocation3 + $0x1] sm:$0x1] %vm872_vm4, %v1153_v62 }
 0x3d2   : > { %v1167_v0 = vsub.f32 %v1122_v44, %v1160_v63  ;;  %v1168_v1 = vsub.f32 %v1696_v38, %v1160_v63  ;;  %v1166_v2 = vsub.f32 %v1693_v33, %v1160_v63  ;;  %v1165_v39 = vsub.f32 %v1112_v35, %v1160_v63 }
 0x3d3   : > { %v1163_v3 = vsub.f32 %v1102_v30, %v1160_v63  ;;  %v1162_v6 = vsub.f32 %v1687_v24, %v1160_v63  ;;  %v1161_v8 = vsub.f32 %v1092_v26, %v1160_v63  ;;  %v1164_v11 = vsub.f32 %v1690_v27, %v1160_v63 }
 0x3d4   : > { %v1181_v4 = vmul.f32 1.442695, %v1167_v0  ;;  %v1183_v5 = vmul.f32 1.442695, %v1168_v1  ;;  %v1179_v7 = vmul.f32 1.442695, %v1166_v2  ;;  %v1154_v27 = vsub.f32 %v1131_v60, %v1153_v62 }
 0x3d5   : > { %v1177_v9 = vmul.f32 1.442695, %v1165_v39  ;;  %v1173_v13 = vmul.f32 1.442695, %v1163_v3  ;;  %v1171_v14 = vmul.f32 1.442695, %v1162_v6 }
 0x3d6   : > { %1777 = vpow2.f32 %v1183_v5  ;;  %v1169_v15 = vmul.f32 1.442695, %v1161_v8  ;;  %v1175_v16 = vmul.f32 1.442695, %v1164_v11  ;;  %v1155_v32 = vmul.f32 1.442695, %v1154_v27 }
 0x3d7   : > { %1779 = vpow2.f32 %v1181_v4  ;;  %v1332_v8 = vld [vmem:[#allocation5] sm:$0xff] }
 0x3d8   : > { %1781 = vpow2.f32 %v1179_v7  ;;  %v1333_v7 = vld [vmem:[#allocation5 + $0x8] sm:$0xff] }
 0x3d9   : > { %1783 = vpow2.f32 %v1177_v9 }
 0x3da   : > { %1785 = vpow2.f32 %v1173_v13 }
 0x3db   : > { %1787 = vpow2.f32 %v1171_v14 }
 0x3dc   : > { %1789 = vpow2.f32 %v1169_v15 }
 0x3dd   : > { %1791 = vpow2.f32 %v1175_v16 }
 0x3de   : > { %1793 = vpow2.f32 %v1155_v32 }
 0x3e3   : > { %v1778_v17 = vpop.eup %1777 }
 0x3e4   : > { %v1780_v18 = vpop.eup %1779  ;;  %1697 = vmatprep.subr.mxu0 %v1778_v17  ;;  %v1200_v42 = vsel %vm471_vm1, %v1778_v17, 0.0 }
 0x3e5   : > { %v1782_v19 = vpop.eup %1781  ;;  %1698 = vmatpush3.msra.mxu0 %v1778_v17  ;;  %v1198_v40 = vsel %vm471_vm1, %v1780_v18, 0.0 }
 0x3e6   : > { %v1784_v20 = vpop.eup %1783  ;;  %1699 = vmatprep.subr.mxu0 %v1780_v18  ;;  %v1196_v36 = vsel %vm471_vm1, %v1782_v19, 0.0 }
 0x3e7   : > { %v1786_v21 = vpop.eup %1785  ;;  %1700 = vmatpush3.msra.mxu0 %v1780_v18  ;;  %v1194_v34 = vsel %vm471_vm1, %v1784_v20, 0.0 }
 0x3e8   : > { %v1788_v22 = vpop.eup %1787  ;;  %1701 = vmatprep.subr.mxu0 %v1782_v19  ;;  %v1190_v29 = vsel %vm471_vm1, %v1786_v21, 0.0 }
 0x3e9   : > { %v1790_v23 = vpop.eup %1789  ;;  %1702 = vmatpush3.msra.mxu0 %v1782_v19  ;;  %v1188_v24 = vsel %vm471_vm1, %v1788_v22, 0.0 }
 0x3ea   : > { %1703 = vmatprep.subr.mxu0 %v1784_v20  ;;  %v1187_v25 = vsel %vm471_vm1, %v1790_v23, 0.0  ;;  %v1792_v26 = vpop.eup %1791 }
 0x3eb   : > { %1704 = vmatpush3.msra.mxu0 %v1784_v20  ;;  %v1189_v28 = vadd.f32 %v1188_v24, %v1187_v25  ;;  %v1192_v31 = vsel %vm471_vm1, %v1792_v26, 0.0  ;;  %v1794_v48 = vpop.eup %1793 }
 0x3ec   : > { %1705 = vmatprep.subr.mxu0 %v1792_v26  ;;  %v1186_v51 = vmul.f32 %v1794_v48, %v1185_v49  ;;  %v1296_v55 = vrot.slane %v1794_v48, %v1979_v10 }
 0x3ed   : > { %1706 = vmatpush3.msra.mxu0 %v1792_v26  ;;  %v1191_v30 = vadd.f32 %v1190_v29, %v1189_v28 }
 0x3ee   : > { %1707 = vmatprep.subr.mxu0 %v1786_v21  ;;  %v1298_v58 = vmul.f32 %v1296_v55, %v1292_v56  ;;  %v1297_v61 = vmul.f32 %v1296_v55, %v1291_v57 }
 0x3ef   : > { %1708 = vmatpush3.msra.mxu0 %v1786_v21  ;;  %v1193_v33 = vadd.f32 %v1192_v31, %v1191_v30 }
 0x3f0   : > { %1709 = vmatprep.subr.mxu0 %v1788_v22 }
 0x3f1   : > { %1710 = vmatpush3.msra.mxu0 %v1788_v22  ;;  %v1195_v35 = vadd.f32 %v1194_v34, %v1193_v33 }
 0x3f2   : > { %1711 = vmatprep.subr.mxu0 %v1790_v23 }
 0x3f3   : > { %v1197_v38 = vadd.f32 %v1196_v36, %v1195_v35  ;;  %1712 = vmatpush3.msra.mxu0 %v1790_v23 }
 0x3f4   : > { %1714 = vmatmul.mubr.msk.f32.vlgmr.msra.gmra.mxu0 %vm471_vm1, %v2004_v12  ;;  %1716 = vmatprep.subr.mxu0 %v1823_v37  ;;  %v1336_v12 = vld [vmem:[%s2071_s6] sm:$0xff] }
 0x3f5   : > { %v1199_v41 = vadd.f32 %v1198_v40, %v1197_v38  ;;  %1724 = vmatprep.mubr.msk.f32.mxu0 %vm1824_vm5, %v1823_v37  ;;  %1339 = vperm.xlu1 %1756, %v1336_v12  }
 0x3f7   : > { %v1201_v43 = vadd.f32 %v1200_v42, %v1199_v41 }
 0x3f9   : > { %v1202_v44 = vrot.slane %v1201_v43, 4 }
 0x3fb   : > { %v1203_v45 = vadd.f32 %v1202_v44, %v1201_v43 }
 0x3fd   : > { %v1204_v46 = vrot.slane %v1203_v45, 2 }
 0x3ff   : > { %v1205_v47 = vadd.f32 %v1204_v46, %v1203_v45 }
 0x401   : > { %v1206_v50 = vrot.slane %v1205_v47, 1 }
 0x403   : > { %v1207_v52 = vadd.f32 %v1206_v50, %v1205_v47 }
 0x405   : > { %v1208_v53 = vadd.f32 %v1207_v52, %v1186_v51 }
 0x407   : > { %1209 = vst.msk [vmem:[#allocation4 + $0x1] sm:$0x1] %vm872_vm4, %v1208_v53 }
 0x40e   : > { %v1319_v54 = vld [vmem:[#allocation4 + $0x1] sm:$0x1] }
 0x40f   : > { %1795 = vrcp.f32 %v1319_v54 }
 0x41c   : > { %v1796_v0 = vpop.eup %1795 }
 0x41d   : > { %v1326_v1 = vrot.slane %v1796_v0, %v1979_v10  ;;  %v1331_v10 = vld [vmem:[%s2070_s5] sm:$0xff] }
 0x470   : > { %v1340_v9 = vpop.permute.xlu1 %1339 }
 0x4b4   : > { %v1715_v59 = vpop.f32.mrf.mxu0 }
 0x4b5   : > { %v1300_v60 = vadd.f32 %v1715_v59, %v1298_v58 }
 0x4b6   : > { %v1282_v62 = vpop.f32.mrf.mxu0 }
 0x4b7   : > { %1302 = vst.msk [vmem:[#allocation5 + $0x18] sm:$0xff] %vm471_vm1, %v1300_v60  ;;  %v1299_v63 = vadd.f32 %v1297_v61, %v1282_v62 }
 0x4b9   : > { %1301 = vst.msk [vmem:[#allocation5 + $0x10] sm:$0xff] %vm471_vm1, %v1299_v63 }
 0x4be   : > { %v1322_v2 = vld [vmem:[#allocation5 + $0x18] sm:$0xff] }
 0x4bf   : > { %v1328_v39 = vmul.f32 %v1326_v1, %v1322_v2 }
 0x4c0   : > { %v1321_v3 = vld [vmem:[#allocation5 + $0x10] sm:$0xff] }
 0x4c1   : > { %1330 = vst.msk [vmem:[#allocation5 + $0x18] sm:$0xff] %vm471_vm1, %v1328_v39  ;;  %v1327_v4 = vmul.f32 %v1326_v1, %v1321_v3 }
 0x4c3   : > { %1329 = vst.msk [vmem:[#allocation5 + $0x10] sm:$0xff] %vm471_vm1, %v1327_v4 }
 0x4c8   : > { %v1335_v5 = vld [vmem:[#allocation5 + $0x18] sm:$0xff] }
 0x4c9   : > { %1717 = vmatpush3.msra.mxu0 %v1335_v5 }
 0x4ca   : > { %1718 = vmatprep.subr.mxu0 %v1823_v37  ;;  %v1334_v6 = vld [vmem:[#allocation5 + $0x10] sm:$0xff] }
 0x4cb   : > { %1719 = vmatpush3.msra.mxu0 %v1334_v6 }
 0x4cc   : > { %1720 = vmatprep.subr.mxu0 %v1823_v37 }
 0x4cd   : > { %1721 = vmatpush3.msra.mxu0 %v1333_v7 }
 0x4ce   : > { %1722 = vmatprep.subr.mxu0 %v1823_v37 }
 0x4cf   : > { %1723 = vmatpush3.msra.mxu0 %v1332_v8 }
 0x4d0   : > { %1725 = vmatmul.mubr.msk.f32.vlgmr.msra.gmra.mxu0 %vm1342_vm6, %v1331_v10 }
 0x590   : > { %v1412_v11 = vpop.f32.mrf.mxu0 }
 0x591   : > { %v1413_v13 = vadd.f32 %v1412_v11, %v1340_v9 }
 0x592   : > { %v1726_v14 = vpop.f32.mrf.mxu0 }
 0x593   : > { %1416 = vst.msk [vmem:[%s356_s30] sm:$0xff] %vm471_vm1, %v1413_v13 }
 0x594 PF: > { %s17_s26 = sadd.s32 1, %s1819_s26   ;;  %s2073_s24 = smov %s1815_s25 }
 0x595   : > { %p14_p5 = scmp.ge.s32.totalorder %s17_s26, 4   ;;  %s2074_s25 = smov %s2076_s27 }
 0x597   :  { %16 = sbr.rel (!%p14_p5) target bundleno = 2 (0x2), region = 92 }

</bundles_post_ra>
